<compile_context>
chip_gen: v7x
topology: tpu7x:2x2x1
jax: 0.10.0
libtpu: 0.0.40
codegen_flags: <defaults>
</compile_context>

<pallas_src>
import functools

import jax
import jax.numpy as jnp
from jax.experimental import pallas as pl
from jax.experimental.pallas import tpu as pltpu


# Batch rows per grid step.  Real VMEM at tb=4096: padded input block
# 4096*128*4 B = 2 MiB per buffer (4 MiB double-buffered) + a few MiB of
# in-kernel activations + a tiny lane-dense output row -> well under v5e's
# 16 MiB default scoped VMEM.  On v6e/v7x this can be raised via batch_tile.
MAX_BATCH_TILE = 4096
VMEM_LIMIT_BYTES = 32 * 1024 * 1024  # explicit; <= physical on every generation


def _round_up(x, m):
    return ((x + m - 1) // m) * m


def critic_kernel(x_ref, w1_ref, b1_ref, w2_ref, b2_ref, w3_ref, b3_ref,
                  o_ref, *, mxu_dtype):
    # Layers 1 & 2: MXU matmuls with operands cast to `mxu_dtype` in-register
    # (bf16 is the native MXU input on v5e/v6e/v7x); f32 accumulation; f32
    # tanh on the EUP.
    x = x_ref[...].astype(mxu_dtype)
    h1 = jnp.tanh(
        jnp.dot(x, w1_ref[...].astype(mxu_dtype),
                preferred_element_type=jnp.float32) + b1_ref[...])
    h2 = jnp.tanh(
        jnp.dot(h1.astype(mxu_dtype), w2_ref[...].astype(mxu_dtype),
                preferred_element_type=jnp.float32) + b2_ref[...])
    # Layer 3 (32 -> 1), computed transposed so the batch lands on the lane
    # axis: contract the feature dim of (1,32) with the feature dim of
    # (tb,32) -> (1, tb) lane-dense row.  (Same A @ B^T dot_general form used
    # by the flash-attention backward kernels.)
    vals = jax.lax.dot_general(
        w3_ref[...].astype(mxu_dtype), h2.astype(mxu_dtype),
        dimension_numbers=(((1,), (1,)), ((), ())),
        preferred_element_type=jnp.float32)
    o_ref[...] = vals + b3_ref[...]          # (1, tb): dense store, dense DMA


@functools.partial(jax.jit, static_argnames=("mxu_bf16", "batch_tile"))
def critic_forward(state, params, mxu_bf16=True, batch_tile=None):
    """Critic MLP: state_dim -> 64 -> tanh -> 32 -> tanh -> 1."""
    # Mirror PyTorch: if state.dim() == 1, unsqueeze(0).
    if state.ndim == 1:
        state = state[None, :]
    # Keep f32/bf16 callers' HBM stream width; only upcast non-float inputs.
    if state.dtype not in (jnp.float32, jnp.bfloat16):
        state = state.astype(jnp.float32)

    w1, b1, w2, b2, w3, b3 = params
    B, S = state.shape

    # Pad rows only to the sublane multiple (8); usually a no-op.  The ragged
    # last batch tile is handled by the grid, so no full-batch pad / extra
    # HBM pass is ever materialised.
    B8 = _round_up(B, 8)
    if B8 != B:
        state = jnp.pad(state, ((0, B8 - B), (0, 0)))

    if batch_tile is None:
        tb = min(MAX_BATCH_TILE, B8)
    else:
        tb = min(_round_up(int(batch_tile), 8), B8)
    nt = (B8 + tb - 1) // tb  # ragged last tile allowed; OOB rows are sliced off

    mxu_dtype = jnp.bfloat16 if mxu_bf16 else jnp.float32
    const2 = lambda i: (0, 0)  # weights/biases: same block every step -> resident

    param_bytes = sum(int(p.size) * p.dtype.itemsize for p in params)
    cost = pl.CostEstimate(
        flops=2 * B8 * (S * 64 + 64 * 32 + 32),
        transcendentals=B8 * 96,
        bytes_accessed=B8 * S * state.dtype.itemsize + nt * tb * 4 + param_bytes,
    )

    out = pl.pallas_call(
        functools.partial(critic_kernel, mxu_dtype=mxu_dtype),
        out_shape=jax.ShapeDtypeStruct((nt, 1, tb), jnp.float32),
        grid=(nt,),
        in_specs=[
            pl.BlockSpec((tb, S), lambda i: (i, 0)),   # state: batch-tiled
            pl.BlockSpec(w1.shape, const2),
            pl.BlockSpec(b1.shape, const2),
            pl.BlockSpec(w2.shape, const2),
            pl.BlockSpec(b2.shape, const2),
            pl.BlockSpec(w3.shape, const2),
            pl.BlockSpec(b3.shape, const2),
        ],
        # Lane-dense (1, tb) row per grid step; block dims equal the full
        # array dims on the last two axes, so stores/DMAs are unmasked.
        out_specs=pl.BlockSpec((None, 1, tb), lambda i: (i, 0, 0)),
        compiler_params=pltpu.CompilerParams(
            # Independent batch tiles -> shard across the 2 TCs on v7x.
            dimension_semantics=("parallel",),
            vmem_limit_bytes=VMEM_LIMIT_BYTES,
        ),
        cost_estimate=cost,
    )(state, w1, b1, w2, b2, w3, b3)

    # out[i, 0, j] is the value of batch row i*tb + j.
    return out.reshape(nt * tb)[:B][:, None]


def init_critic_params(key, state_dim):
    """PyTorch nn.Linear-style init U(-1/sqrt(fan_in), +1/sqrt(fan_in)).

    Returns (w1, b1, w2, b2, w3_row, b3) with w1:(S,64), w2:(64,32),
    w3_row:(1,32) and biases as (1, out) rows.
    """
    params = []
    dims = [(state_dim, 64), (64, 32), (32, 1)]
    for li, (fan_in, fan_out) in enumerate(dims):
        key, kw, kb = jax.random.split(key, 3)
        bound = 1.0 / jnp.sqrt(fan_in)
        if li < 2:
            w = jax.random.uniform(kw, (fan_in, fan_out), jnp.float32, -bound, bound)
        else:
            # Last layer stored as the (1, 32) weight row (PyTorch layout).
            w = jax.random.uniform(kw, (fan_out, fan_in), jnp.float32, -bound, bound)
        b = jax.random.uniform(kb, (1, fan_out), jnp.float32, -bound, bound)
        params += [w, b]
    return tuple(params)


def _reference(state, params):
    """Pure-JAX reference for correctness check."""
    if state.ndim == 1:
        state = state[None, :]
    w1, b1, w2, b2, w3, b3 = params
    h1 = jnp.tanh(state @ w1 + b1)
    h2 = jnp.tanh(h1 @ w2 + b2)
    return h2 @ w3.T + b3


if __name__ == "__main__":
    key = jax.random.PRNGKey(0)
    k_param, k_state, k_state2, k_state3 = jax.random.split(key, 4)

    state_dim = 16
    batch = 2

    params = init_critic_params(k_param, state_dim)
    state = jax.random.normal(k_state, (batch, state_dim), jnp.float32)
    ref = _reference(state, params)

    # Default path: bf16 MXU operands inside the kernel (HBM stream stays
    # f32; accumulation and tanh stay f32) -> bf16-level tolerance.
    value = critic_forward(state, params)
    jax.block_until_ready(value)
    assert value.shape == (batch, 1), value.shape
    assert jnp.allclose(value, ref, atol=5e-2, rtol=5e-2), (value, ref)

    # Exact-f32 path.
    value_f32 = critic_forward(state, params, mxu_bf16=False)
    jax.block_until_ready(value_f32)
    assert jnp.allclose(value_f32, ref, atol=1e-5, rtol=1e-5), (value_f32, ref)

    # 1-D (single state) path, like the PyTorch unsqueeze branch.
    single = critic_forward(state[0], params, mxu_bf16=False)
    jax.block_until_ready(single)
    assert single.shape == (1, 1)
    assert jnp.allclose(single, ref[:1], atol=1e-5, rtol=1e-5)

    # Batch that is not a multiple of 8 (exercises the minimal sublane pad).
    state19 = jax.random.normal(k_state2, (19, state_dim), jnp.float32)
    value19 = critic_forward(state19, params, mxu_bf16=False)
    jax.block_until_ready(value19)
    assert value19.shape == (19, 1)
    assert jnp.allclose(value19, _reference(state19, params), atol=1e-5, rtol=1e-5)

    # Multi-tile grid with a ragged last tile (no full-batch pad is done).
    state300 = jax.random.normal(k_state3, (300, state_dim), jnp.float32)
    value300 = critic_forward(state300, params, mxu_bf16=False, batch_tile=128)
    jax.block_until_ready(value300)
    assert value300.shape == (300, 1)
    assert jnp.allclose(value300, _reference(state300, params), atol=1e-5, rtol=1e-5)

    print("KERNEL_OK")
</pallas_src>

<mosaic_0001>
module attributes {stable_mosaic.version = 11 : i64} {
  func.func @critic_kernel(%arg0: i32, %arg1: memref<8x16xf32, #tpu.memory_space<vmem>>, %arg2: memref<16x64xf32, #tpu.memory_space<vmem>>, %arg3: memref<1x64xf32, #tpu.memory_space<vmem>>, %arg4: memref<64x32xf32, #tpu.memory_space<vmem>>, %arg5: memref<1x32xf32, #tpu.memory_space<vmem>>, %arg6: memref<1x32xf32, #tpu.memory_space<vmem>>, %arg7: memref<1x1xf32, #tpu.memory_space<vmem>>, %arg8: memref<1x1x8xf32, #tpu.memory_space<vmem>>) attributes {dimension_semantics = [#tpu.dimension_semantics<parallel>], iteration_bounds = array<i64: 1>, scalar_prefetch = 0 : i64, scratch_operands = 0 : i64, tpu.core_type = #tpu.core_type<tc>, window_params = [{transform_indices = @transform_0, window_bounds = array<i64: 8, 16>}, {pipeline_mode = #tpu.pipeline_mode<synchronous>, transform_indices = @transform_1, window_bounds = array<i64: 16, 64>}, {pipeline_mode = #tpu.pipeline_mode<synchronous>, transform_indices = @transform_2, window_bounds = array<i64: 1, 64>}, {pipeline_mode = #tpu.pipeline_mode<synchronous>, transform_indices = @transform_3, window_bounds = array<i64: 64, 32>}, {pipeline_mode = #tpu.pipeline_mode<synchronous>, transform_indices = @transform_4, window_bounds = array<i64: 1, 32>}, {pipeline_mode = #tpu.pipeline_mode<synchronous>, transform_indices = @transform_5, window_bounds = array<i64: 1, 32>}, {pipeline_mode = #tpu.pipeline_mode<synchronous>, transform_indices = @transform_6, window_bounds = array<i64: 1, 1>}, {transform_indices = @transform_7, window_bounds = array<i64: 1, 1, 8>}]} {
    %c0 = arith.constant 0 : index
    %c0_0 = arith.constant 0 : index
    %0 = vector.load %arg1[%c0, %c0_0] : memref<8x16xf32, #tpu.memory_space<vmem>>, vector<8x16xf32>
    %1 = arith.truncf %0 : vector<8x16xf32> to vector<8x16xbf16>
    %c0_1 = arith.constant 0 : index
    %c0_2 = arith.constant 0 : index
    %2 = vector.load %arg2[%c0_1, %c0_2] : memref<16x64xf32, #tpu.memory_space<vmem>>, vector<16x64xf32>
    %3 = arith.truncf %2 : vector<16x64xf32> to vector<16x64xbf16>
    %cst = arith.constant dense<0.000000e+00> : vector<8x64xf32>
    %4 = tpu.matmul %1, %3, %cst {dimension_numbers = #tpu.dot_dimension_numbers<[1], [0], [0], [1], [0, 0, 1, 1], [], []>} : vector<8x16xbf16>, vector<16x64xbf16>, vector<8x64xf32> -> vector<8x64xf32>
    %c0_3 = arith.constant 0 : index
    %c0_4 = arith.constant 0 : index
    %5 = vector.load %arg3[%c0_3, %c0_4] : memref<1x64xf32, #tpu.memory_space<vmem>>, vector<1x64xf32>
    %6 = vector.broadcast %5 : vector<1x64xf32> to vector<8x64xf32>
    %7 = arith.addf %4, %6 : vector<8x64xf32>
    %8 = math.tanh %7 : vector<8x64xf32>
    %9 = arith.truncf %8 : vector<8x64xf32> to vector<8x64xbf16>
    %c0_5 = arith.constant 0 : index
    %c0_6 = arith.constant 0 : index
    %10 = vector.load %arg4[%c0_5, %c0_6] : memref<64x32xf32, #tpu.memory_space<vmem>>, vector<64x32xf32>
    %11 = arith.truncf %10 : vector<64x32xf32> to vector<64x32xbf16>
    %cst_7 = arith.constant dense<0.000000e+00> : vector<8x32xf32>
    %12 = tpu.matmul %9, %11, %cst_7 {dimension_numbers = #tpu.dot_dimension_numbers<[1], [0], [0], [1], [0, 0, 1, 1], [], []>} : vector<8x64xbf16>, vector<64x32xbf16>, vector<8x32xf32> -> vector<8x32xf32>
    %c0_8 = arith.constant 0 : index
    %c0_9 = arith.constant 0 : index
    %13 = vector.load %arg5[%c0_8, %c0_9] : memref<1x32xf32, #tpu.memory_space<vmem>>, vector<1x32xf32>
    %14 = vector.broadcast %13 : vector<1x32xf32> to vector<8x32xf32>
    %15 = arith.addf %12, %14 : vector<8x32xf32>
    %16 = math.tanh %15 : vector<8x32xf32>
    %c0_10 = arith.constant 0 : index
    %c0_11 = arith.constant 0 : index
    %17 = vector.load %arg6[%c0_10, %c0_11] : memref<1x32xf32, #tpu.memory_space<vmem>>, vector<1x32xf32>
    %18 = arith.truncf %17 : vector<1x32xf32> to vector<1x32xbf16>
    %19 = arith.truncf %16 : vector<8x32xf32> to vector<8x32xbf16>
    %cst_12 = arith.constant dense<0.000000e+00> : vector<1x8xf32>
    %20 = tpu.matmul %18, %19, %cst_12 {dimension_numbers = #tpu.dot_dimension_numbers<[1], [1], [0], [0], [0, 0, 1, 0], [], []>} : vector<1x32xbf16>, vector<8x32xbf16>, vector<1x8xf32> -> vector<1x8xf32>
    %c0_13 = arith.constant 0 : index
    %c0_14 = arith.constant 0 : index
    %21 = vector.load %arg7[%c0_13, %c0_14] : memref<1x1xf32, #tpu.memory_space<vmem>>, vector<1x1xf32>
    %22 = vector.broadcast %21 : vector<1x1xf32> to vector<1x8xf32>
    %23 = arith.addf %20, %22 : vector<1x8xf32>
    %c0_15 = arith.constant 0 : index
    %c0_16 = arith.constant 0 : index
    %c0_17 = arith.constant 0 : index
    %24 = vector.load %arg8[%c0_15, %c0_16, %c0_17] : memref<1x1x8xf32, #tpu.memory_space<vmem>>, vector<1x1x8xf32>
    %25 = vector.shape_cast %24 : vector<1x1x8xf32> to vector<1x8xf32>
    %26 = vector.shape_cast %23 : vector<1x8xf32> to vector<1x1x8xf32>
    tpu.vector_store %arg8[%c0_15, %c0_16, %c0_17], %26 {strides = array<i32>} : memref<1x1x8xf32, #tpu.memory_space<vmem>>, vector<1x1x8xf32>,
    return
  }
  func.func @transform_0(%arg0: i32) -> (i32, i32) {
    %c0_i32 = arith.constant 0 : i32
    %c0_i32_0 = arith.constant 0 : i32
    return %arg0, %c0_i32 : i32, i32
  }
  func.func @transform_1(%arg0: i32) -> (i32, i32) {
    %c0_i32 = arith.constant 0 : i32
    %c0_i32_0 = arith.constant 0 : i32
    %c0_i32_1 = arith.constant 0 : i32
    return %c0_i32, %c0_i32_0 : i32, i32
  }
  func.func @transform_2(%arg0: i32) -> (i32, i32) {
    %c0_i32 = arith.constant 0 : i32
    %c0_i32_0 = arith.constant 0 : i32
    %c0_i32_1 = arith.constant 0 : i32
    return %c0_i32, %c0_i32_0 : i32, i32
  }
  func.func @transform_3(%arg0: i32) -> (i32, i32) {
    %c0_i32 = arith.constant 0 : i32
    %c0_i32_0 = arith.constant 0 : i32
    %c0_i32_1 = arith.constant 0 : i32
    return %c0_i32, %c0_i32_0 : i32, i32
  }
  func.func @transform_4(%arg0: i32) -> (i32, i32) {
    %c0_i32 = arith.constant 0 : i32
    %c0_i32_0 = arith.constant 0 : i32
    %c0_i32_1 = arith.constant 0 : i32
    return %c0_i32, %c0_i32_0 : i32, i32
  }
  func.func @transform_5(%arg0: i32) -> (i32, i32) {
    %c0_i32 = arith.constant 0 : i32
    %c0_i32_0 = arith.constant 0 : i32
    %c0_i32_1 = arith.constant 0 : i32
    return %c0_i32, %c0_i32_0 : i32, i32
  }
  func.func @transform_6(%arg0: i32) -> (i32, i32) {
    %c0_i32 = arith.constant 0 : i32
    %c0_i32_0 = arith.constant 0 : i32
    %c0_i32_1 = arith.constant 0 : i32
    return %c0_i32, %c0_i32_0 : i32, i32
  }
  func.func @transform_7(%arg0: i32) -> (i32, i32, i32) {
    %c0_i32 = arith.constant 0 : i32
    %c0_i32_0 = arith.constant 0 : i32
    %c0_i32_1 = arith.constant 0 : i32
    return %arg0, %c0_i32, %c0_i32_0 : i32, i32, i32
  }
}

</mosaic_0001>

<bundles_post_ra>
// kernel: critic_forward.1
= control target key start
LH: loop header
LB: loop body
LE: loop exit
PB: predicated region body
PF: predicated region fallthrough
CT: control target
= control target key end

     0   :  { %v263_v0 = vmov 0.0   ;;  %vm264_vm0 = vmmov 0   ;;  %vm41_vm1 = vcmask 130048   ;;  %vm106_vm2 = vcmask 523264   ;;  %s354_s1 = inlined_call_operand.vmem [shape: f32[16,64], index: 1, kind: input, shape index: {}]   ;;  %s355_s0 = inlined_call_operand.vmem [shape: f32[8,16], index: 0, kind: input, shape index: {}]   ;;  %s356_s3 = inlined_call_operand.vmem [shape: f32[64,32], index: 3, kind: input, shape index: {}]   ;;  %s357_s2 = inlined_call_operand.vmem [shape: f32[1,64], index: 2, kind: input, shape index: {}]   ;;  %s358_s6 = inlined_call_operand.<no memory space> [shape: f32[1,1], index: 6, kind: input, shape index: {}]   ;;  %s359_s4 = inlined_call_operand.vmem [shape: f32[1,32], index: 4, kind: input, shape index: {}]   ;;  %s360_s5 = inlined_call_operand.vmem [shape: f32[1,32], index: 5, kind: input, shape index: {}]   ;;  %s361_s7 = inlined_call_operand.vmem [shape: f32[1,1,8], index: 7, kind: output, shape index: {}]  }
   0x1   :  { %231 = vmatprep.subr.bf16.mxu0 %v263_v0  ;;  %v31_v1 = vld [vmem:[%s354_s1] sm:$0xff]  ;;  %v32_v2 = vld [vmem:[%s354_s1 + $0x8] sm:$0xff]  ;;  %233 = vmatprep.mubr.msk.bf16.mxu0 %vm264_vm0, %v263_v0  ;;  %v89_v9 = vld [vmem:[%s356_s3 + $0x10] sm:$0xff]  ;;  %v265_v26 = vmov 0   ;;  %v12_v27 = vstv %s358_s6  ;;  %vm164_vm3 = vcmask 261120   ;;  %v160_v40 = vlaneseq }
   0x2   :  { %v29_v3 = vld [vmem:[%s355_s0] sm:$0xff]  ;;  %v33_v4 = vpack.c.bf16 %v32_v2, %v31_v1  ;;  %237 = vmatprep.subr.bf16.mxu1 %v263_v0  ;;  %245 = vmatprep.mubr.msk.bf16.mxu1 %vm264_vm0, %v263_v0  ;;  %v88_v7 = vld [vmem:[%s356_s3 + $0x8] sm:$0xff]  ;;  %v90_v10 = vld [vmem:[%s356_s3 + $0x18] sm:$0xff]  ;;  %13 = vst [vmem:[#allocation2] sm:$0x1] %v12_v27  ;;  %vm211_vm4 = vcmask 57344  }
   0x3   :  { %v30_v5 = vpack.c.bf16 %v29_v3, %v29_v3  ;;  %v87_v6 = vld [vmem:[%s356_s3] sm:$0xff]  ;;  %v96_v11 = vpack.c.bf16 %v90_v10, %v89_v9  ;;  %v92_v13 = vld [vmem:[%s356_s3 + $0x28] sm:$0xff]  ;;  %v93_v15 = vld [vmem:[%s356_s3 + $0x30] sm:$0xff]  ;;  %258 = vset.pattern.permute.xlu0 %v265_v26  ;;  %v161_v41 = vshrl.u32 %v160_v40, 7 }
   0x4   :  { %232 = vmatpush3.bf16.msra.mxu0 %v33_v4  ;;  %v95_v8 = vpack.c.bf16 %v88_v7, %v87_v6  ;;  %v91_v12 = vld [vmem:[%s356_s3 + $0x20] sm:$0xff]  ;;  %v94_v16 = vld [vmem:[%s356_s3 + $0x38] sm:$0xff] }
   0x5   :  { %249 = vmatprep.subr.bf16.mxu0 %v263_v0  ;;  %v97_v14 = vpack.c.bf16 %v92_v13, %v91_v12  ;;  %v98_v17 = vpack.c.bf16 %v94_v16, %v93_v15  ;;  %v217_v18 = vld [vmem:[%s357_s2] ss:$0 sm:$0xff]  ;;  %v162_v42 = vsub.s32 0, %v161_v41 }
   0x6   :  { %238 = vmatpush3.bf16.msra.mxu1 %v95_v8  ;;  %v219_v29 = vld [vmem:[%s359_s4] ss:$0 sm:$0xff] }
   0x7   :  { %234 = vmatmul.mubr.msk.bf16.vlgmr.msra.gmra.mrb[0].mxu0 %vm41_vm1, %v30_v5  ;;  %239 = vmatprep.subr.bf16.mxu1 %v263_v0  ;;  %v151_v38 = vld [vmem:[%s360_s5] sm:$0x1] }
   0x8   :  { %251 = vmatprep.mubr.msk.bf16.mxu0 %vm264_vm0, %v263_v0  ;;  %v152_v39 = vpack.c.bf16 %v151_v38, %v151_v38 }
   0x9   :  { %v154_v28 = vld [vmem:[#allocation2] sm:$0x1] }
   0xa   :  { %240 = vmatpush3.bf16.msra.mxu1 %v96_v11  ;;  %157 = vperm.xlu0 %258, %v154_v28  }
   0xb   :  { %241 = vmatprep.subr.bf16.mxu1 %v263_v0 }
   0xe   :  { %242 = vmatpush3.bf16.msra.mxu1 %v97_v14 }
   0xf   :  { %243 = vmatprep.subr.bf16.mxu1 %v263_v0 }
  0x12   :  { %244 = vmatpush3.bf16.msra.mxu1 %v98_v17 }
  0x89   :  { %v158_v43 = vpop.permute.xlu0 %157 }
  0x8a   :  { %v163_v44 = vrot.slane %v158_v43, %v162_v42 }
  0xda   :  { %v79_v19 = vpop.f32.mrb[0].mxu0 }
  0xdb   :  { %v80_v20 = vadd.f32 %v217_v18, %v79_v19  ;;  %v235_v21 = vpop.f32.mrb[1].mxu0 }
  0xdc   :  { %v82_v22 = vpop.f32.mrb[2].mxu0 }
  0xdd   :  { %259 = vtanh.f32 %v80_v20  ;;  %v236_v23 = vpop.f32.mrb[3].mxu0 }
  0xe7   :  { %v260_v24 = vpop.eup %259 }
  0xe8   :  { %v86_v25 = vpack.c.bf16 %v260_v24, %v260_v24 }
  0xea   :  { %246 = vmatmul.mubr.msk.bf16.vlgmr.msra.gmra.mrb[0].mxu1 %vm106_vm2, %v86_v25 }
 0x1bd   :  { %v144_v30 = vpop.f32.mrb[0].mxu1 }
 0x1be   :  { %v145_v31 = vadd.f32 %v219_v29, %v144_v30  ;;  %v247_v32 = vpop.f32.mrb[1].mxu1 }
 0x1bf   :  { %v147_v33 = vpop.f32.mrb[2].mxu1 }
 0x1c0   :  { %261 = vtanh.f32 %v145_v31  ;;  %v248_v34 = vpop.f32.mrb[3].mxu1 }
 0x1ca   :  { %v262_v35 = vpop.eup %261 }
 0x1cb   :  { %v153_v36 = vpack.c.bf16 %v262_v35, %v262_v35 }
 0x1cd   :  { %v169_v37 = vsel %vm164_vm3, %v153_v36, 0 }
 0x1ce   :  { %250 = vmatpush3.bf16.xpose.msra.mxu0 %v169_v37 }
 0x1d5   :  { %252 = vmatmul.mubr.msk.bf16.vlgmr.msra.gmra.mrb[4].mxu0 %vm164_vm3, %v152_v39 }
 0x2a8   :  { %v205_v45 = vpop.f32.mrb[4].mxu0 }
 0x2a9   :  { %v206_v46 = vadd.f32 %v205_v45, %v163_v44  ;;  %v253_v47 = vpop.f32.mrb[5].mxu0 }
 0x2aa   :  { %v208_v48 = vpop.f32.mrb[6].mxu0 }
 0x2ab   :  { %212 = vst.msk [vmem:[%s361_s7] sm:$0x1] %vm211_vm4, %v206_v46  ;;  %v254_v49 = vpop.f32.mrb[7].mxu0 }

</bundles_post_ra>
